<compile_context>
chip_gen: v5e
topology: v5e:2x2
jax: 0.10.0
libtpu: 0.0.40
codegen_flags: <defaults>
</compile_context>

<pallas_src>
import functools
import math

import jax
import jax.numpy as jnp
from jax.experimental import pallas as pl
from jax.experimental.pallas import tpu as pltpu


def _round_up(n, m):
    return ((n + m - 1) // m) * m


def _pad2(a, rows, cols):
    return jnp.pad(a, ((0, rows - a.shape[0]), (0, cols - a.shape[1])))


def cvae_kernel(
    # batched inputs
    xc_ref, eps_ref, head_cb_ref, dec1_cb_ref,
    # encoder
    w1_ref, b1_ref, w2_ref, b2_ref, w3_ref, b3_ref,
    # fused mu/logvar head (h-part only; c-part is in head_cb)
    wh_ref,
    # decoder (d1 is z-part only; c-part is in dec1_cb)
    d1_ref, d2_ref, db2_ref, d3_ref, db3_ref, d4_ref, db4_ref,
    # outputs
    head_ref, xhat_ref,
    *, lp,
):
    f32 = jnp.float32
    bf16 = jnp.bfloat16

    # ---- recognition model: encoder([x | c]) -- one bf16 matmul per layer ----
    h = jnp.dot(xc_ref[...], w1_ref[...], preferred_element_type=f32) + b1_ref[...]
    h = jnp.maximum(h, 0.0)
    h = jnp.maximum(
        jnp.dot(h.astype(bf16), w2_ref[...], preferred_element_type=f32) + b2_ref[...], 0.0)
    h = jnp.maximum(
        jnp.dot(h.astype(bf16), w3_ref[...], preferred_element_type=f32) + b3_ref[...], 0.0)

    # ---- fused mu/logvar head: single (Hp, 2*Lp) matmul, packed [mu | logvar] ----
    head = jnp.dot(h.astype(bf16), wh_ref[...], preferred_element_type=f32) + head_cb_ref[...]
    mu = head[:, :lp]          # 128-aligned static slices (zero cost)
    logvar = head[:, lp:]

    # ---- reparametrize: z = eps * exp(0.5 * logvar) + mu (f32) ----
    z = eps_ref[...] * jnp.exp(0.5 * logvar) + mu

    # ---- generation model: decoder([z | c]) ----
    g = jnp.maximum(
        jnp.dot(z.astype(bf16), d1_ref[...], preferred_element_type=f32) + dec1_cb_ref[...], 0.0)
    g = jnp.maximum(
        jnp.dot(g.astype(bf16), d2_ref[...], preferred_element_type=f32) + db2_ref[...], 0.0)
    g = jnp.maximum(
        jnp.dot(g.astype(bf16), d3_ref[...], preferred_element_type=f32) + db3_ref[...], 0.0)
    logits = jnp.dot(g.astype(bf16), d4_ref[...], preferred_element_type=f32) + db4_ref[...]

    # numerically-stable sigmoid; approx reciprocal goes to the EUP slot
    e = jnp.exp(-jnp.abs(logits))
    inv = pl.reciprocal(1.0 + e, approx=True)
    xhat = jnp.where(logits >= 0.0, inv, e * inv)

    head_ref[...] = head
    xhat_ref[...] = xhat


def _linear_params(key, fan_in, fan_out):
    # Mirrors torch.nn.Linear default init: U(-1/sqrt(fan_in), 1/sqrt(fan_in)).
    kw, kb = jax.random.split(key)
    bound = 1.0 / math.sqrt(fan_in)
    w = jax.random.uniform(kw, (fan_in, fan_out), jnp.float32, -bound, bound)
    b = jax.random.uniform(kb, (1, fan_out), jnp.float32, -bound, bound)
    return w, b


def init_cvae_params(key, *, input_size, latent_size, num_classes, hidden_units):
    keys = jax.random.split(key, 9)
    p = {}
    p["enc1"] = _linear_params(keys[0], input_size + num_classes, hidden_units)
    p["enc2"] = _linear_params(keys[1], hidden_units, hidden_units)
    p["enc3"] = _linear_params(keys[2], hidden_units, hidden_units)
    p["mu"] = _linear_params(keys[3], hidden_units + num_classes, latent_size)
    p["logvar"] = _linear_params(keys[4], hidden_units + num_classes, latent_size)
    p["dec1"] = _linear_params(keys[5], latent_size + num_classes, hidden_units)
    p["dec2"] = _linear_params(keys[6], hidden_units, hidden_units)
    p["dec3"] = _linear_params(keys[7], hidden_units, hidden_units)
    p["dec4"] = _linear_params(keys[8], hidden_units, input_size)
    return p


def cvae_forward(x, c, eps, params, *, input_size, latent_size, num_classes,
                 hidden_units, batch_tile=256):
    B = x.shape[0]
    D, C, H, L = input_size, num_classes, hidden_units, latent_size

    # Lane-padded sizes (everything a multiple of 128 on the lane axis).
    Dp = _round_up(D, 128)
    Hp = _round_up(H, 128)
    Lp = _round_up(L, 128)
    Kxc = _round_up(D + C, 128)
    BM = min(batch_tile, _round_up(B, 8))
    B_pad = _round_up(B, BM)

    bf16 = jnp.bfloat16

    x_flat = x.reshape(B, -1).astype(jnp.float32)
    assert x_flat.shape[1] == D
    c = c.astype(jnp.float32)
    eps = eps.astype(jnp.float32)

    # [x | c] concatenated in the wrapper -> one lane-dense bf16 matmul in-kernel.
    xc = jnp.concatenate([x_flat, c], axis=1)
    xc = jnp.pad(xc, ((0, B_pad - B), (0, Kxc - (D + C)))).astype(bf16)
    eps_p = jnp.pad(eps, ((0, B_pad - B), (0, Lp - L)))

    w1, b1 = params["enc1"]      # (D+C, H), (1, H)
    w2, b2 = params["enc2"]
    w3, b3 = params["enc3"]
    wm, bm = params["mu"]        # (H+C, L)
    wv, bv = params["logvar"]
    d1, db1 = params["dec1"]     # (L+C, H)
    d2, db2 = params["dec2"]
    d3, db3 = params["dec3"]
    d4, db4 = params["dec4"]     # (H, D)

    # Zero-padded bf16 weights (HBM traffic / VMEM residency halved); f32 biases.
    w1_p = _pad2(w1, Kxc, Hp).astype(bf16)
    b1_p = _pad2(b1, 1, Hp)
    w2_p = _pad2(w2, Hp, Hp).astype(bf16)
    b2_p = _pad2(b2, 1, Hp)
    w3_p = _pad2(w3, Hp, Hp).astype(bf16)
    b3_p = _pad2(b3, 1, Hp)

    # Fused mu/logvar head: h-part packed as [mu | logvar], each Lp lanes wide.
    wh = jnp.zeros((Hp, 2 * Lp), jnp.float32)
    wh = wh.at[:H, :L].set(wm[:H])
    wh = wh.at[:H, Lp:Lp + L].set(wv[:H])
    wh = wh.astype(bf16)

    # Per-row c-contribution + bias for the head (tiny XLA glue, done once).
    head_cb = jnp.zeros((B_pad, 2 * Lp), jnp.float32)
    head_cb = head_cb.at[:B, :L].set(c @ wm[H:] + bm)
    head_cb = head_cb.at[:B, Lp:Lp + L].set(c @ wv[H:] + bv)

    # Decoder first layer: z-part as matmul, c-part folded into per-row bias.
    d1_p = _pad2(d1[:L], Lp, Hp).astype(bf16)
    dec1_cb = jnp.zeros((B_pad, Hp), jnp.float32)
    dec1_cb = dec1_cb.at[:B, :H].set(c @ d1[L:] + db1)

    d2_p = _pad2(d2, Hp, Hp).astype(bf16)
    db2_p = _pad2(db2, 1, Hp)
    d3_p = _pad2(d3, Hp, Hp).astype(bf16)
    db3_p = _pad2(db3, 1, Hp)
    d4_p = _pad2(d4, Hp, Dp).astype(bf16)
    db4_p = _pad2(db4, 1, Dp)

    batch_idx = lambda i: (i, 0)
    const_idx = lambda i: (0, 0)   # weights stay resident across batch tiles

    in_specs = [
        pl.BlockSpec((BM, Kxc), batch_idx),       # xc (bf16)
        pl.BlockSpec((BM, Lp), batch_idx),        # eps
        pl.BlockSpec((BM, 2 * Lp), batch_idx),    # head c-contribution + bias
        pl.BlockSpec((BM, Hp), batch_idx),        # dec1 c-contribution + bias
        pl.BlockSpec((Kxc, Hp), const_idx),       # w1
        pl.BlockSpec((1, Hp), const_idx),         # b1
        pl.BlockSpec((Hp, Hp), const_idx),        # w2
        pl.BlockSpec((1, Hp), const_idx),         # b2
        pl.BlockSpec((Hp, Hp), const_idx),        # w3
        pl.BlockSpec((1, Hp), const_idx),         # b3
        pl.BlockSpec((Hp, 2 * Lp), const_idx),    # fused head weight
        pl.BlockSpec((Lp, Hp), const_idx),        # d1 (z part)
        pl.BlockSpec((Hp, Hp), const_idx),        # d2
        pl.BlockSpec((1, Hp), const_idx),         # db2
        pl.BlockSpec((Hp, Hp), const_idx),        # d3
        pl.BlockSpec((1, Hp), const_idx),         # db3
        pl.BlockSpec((Hp, Dp), const_idx),        # d4
        pl.BlockSpec((1, Dp), const_idx),         # db4
    ]
    out_specs = (
        pl.BlockSpec((BM, 2 * Lp), batch_idx),    # packed [mu | logvar]
        pl.BlockSpec((BM, Dp), batch_idx),        # x_hat (lane-padded)
    )
    out_shape = (
        jax.ShapeDtypeStruct((B_pad, 2 * Lp), jnp.float32),
        jax.ShapeDtypeStruct((B_pad, Dp), jnp.float32),
    )

    matmul_flops = 2 * B_pad * (Kxc * Hp + 4 * Hp * Hp + Hp * 2 * Lp + Lp * Hp + Hp * Dp)
    weight_bytes = 2 * (Kxc * Hp + 4 * Hp * Hp + Hp * 2 * Lp + Lp * Hp + Hp * Dp)
    bias_bytes = 4 * (5 * Hp + Dp)
    io_bytes = B_pad * (2 * Kxc + 4 * (Lp + 2 * Lp + Hp + 2 * Lp + Dp))
    cost = pl.CostEstimate(
        flops=matmul_flops,
        transcendentals=B_pad * (Lp + Dp),
        bytes_accessed=weight_bytes + bias_bytes + io_bytes,
    )

    head_out, xhat_pad = pl.pallas_call(
        functools.partial(cvae_kernel, lp=Lp),
        out_shape=out_shape,
        grid=(B_pad // BM,),
        in_specs=in_specs,
        out_specs=out_specs,
        compiler_params=pltpu.CompilerParams(
            dimension_semantics=("parallel",)),
        cost_estimate=cost,
    )(xc, eps_p, head_cb, dec1_cb,
      w1_p, b1_p, w2_p, b2_p, w3_p, b3_p,
      wh,
      d1_p, d2_p, db2_p, d3_p, db3_p, d4_p, db4_p)

    mu = head_out[:B, :L]
    logvar = head_out[:B, Lp:Lp + L]
    Himg = int(math.isqrt(D))
    x_hat = xhat_pad[:B, :D].reshape(B, 1, Himg, Himg)   # nn.Unflatten
    return x_hat, mu, logvar


def cvae_reference(x, c, eps, params):
    """Pure-JAX (f32) reference of the PyTorch module's forward."""
    B = x.shape[0]
    x_flat = x.reshape(B, -1).astype(jnp.float32)
    c = c.astype(jnp.float32)
    w1, b1 = params["enc1"]
    w2, b2 = params["enc2"]
    w3, b3 = params["enc3"]
    wm, bm = params["mu"]
    wv, bv = params["logvar"]
    d1, db1 = params["dec1"]
    d2, db2 = params["dec2"]
    d3, db3 = params["dec3"]
    d4, db4 = params["dec4"]
    xc = jnp.concatenate([x_flat, c], 1)
    h = jax.nn.relu(xc @ w1 + b1)
    h = jax.nn.relu(h @ w2 + b2)
    h = jax.nn.relu(h @ w3 + b3)
    hc = jnp.concatenate([h, c], 1)
    mu = hc @ wm + bm
    logvar = hc @ wv + bv
    z = eps * jnp.exp(0.5 * logvar) + mu
    zc = jnp.concatenate([z, c], 1)
    g = jax.nn.relu(zc @ d1 + db1)
    g = jax.nn.relu(g @ d2 + db2)
    g = jax.nn.relu(g @ d3 + db3)
    xhat = jax.nn.sigmoid(g @ d4 + db4)
    Himg = int(math.isqrt(x_flat.shape[1]))
    return xhat.reshape(B, 1, Himg, Himg), mu, logvar


if __name__ == "__main__":
    # Small shapes consistent with the module's forward:
    #   x: (B, 1, Himg, Himg), c: (B, num_classes) one-hot
    B = 2
    Himg = 8
    input_size = Himg * Himg      # 64
    latent_size = 8
    num_classes = 10
    hidden_units = 32

    root = jax.random.PRNGKey(0)
    k_param, k_x, k_lbl, k_eps = jax.random.split(root, 4)

    params = init_cvae_params(
        k_param,
        input_size=input_size,
        latent_size=latent_size,
        num_classes=num_classes,
        hidden_units=hidden_units,
    )

    x = jax.random.uniform(k_x, (B, 1, Himg, Himg), jnp.float32)
    labels = jax.random.randint(k_lbl, (B,), 0, num_classes)
    c = jax.nn.one_hot(labels, num_classes, dtype=jnp.float32)
    # eps ~ N(0, 1) for the reparametrization trick (sampled outside the kernel).
    eps = jax.random.normal(k_eps, (B, latent_size), jnp.float32)

    x_hat, mu, logvar = cvae_forward(
        x, c, eps, params,
        input_size=input_size,
        latent_size=latent_size,
        num_classes=num_classes,
        hidden_units=hidden_units,
    )
    jax.block_until_ready((x_hat, mu, logvar))

    assert x_hat.shape == (B, 1, Himg, Himg)
    assert mu.shape == (B, latent_size)
    assert logvar.shape == (B, latent_size)
    assert bool(jnp.all((x_hat >= 0.0) & (x_hat <= 1.0)))

    # Compare against the pure-JAX f32 reference (bf16 weights/activations -> loose tol).
    xr, mr, lr = cvae_reference(x, c, eps, params)
    assert bool(jnp.allclose(mu, mr, atol=1e-1, rtol=1e-1))
    assert bool(jnp.allclose(logvar, lr, atol=1e-1, rtol=1e-1))
    assert bool(jnp.allclose(x_hat, xr, atol=1e-1, rtol=1e-1))

    print("KERNEL_OK")
</pallas_src>

<mosaic_0001>
module attributes {stable_mosaic.version = 11 : i64} {
  func.func @cvae_kernel(%arg0: i32, %arg1: memref<8x128xbf16, #tpu.memory_space<vmem>>, %arg2: memref<8x128xf32, #tpu.memory_space<vmem>>, %arg3: memref<8x256xf32, #tpu.memory_space<vmem>>, %arg4: memref<8x128xf32, #tpu.memory_space<vmem>>, %arg5: memref<128x128xbf16, #tpu.memory_space<vmem>>, %arg6: memref<1x128xf32, #tpu.memory_space<vmem>>, %arg7: memref<128x128xbf16, #tpu.memory_space<vmem>>, %arg8: memref<1x128xf32, #tpu.memory_space<vmem>>, %arg9: memref<128x128xbf16, #tpu.memory_space<vmem>>, %arg10: memref<1x128xf32, #tpu.memory_space<vmem>>, %arg11: memref<128x256xbf16, #tpu.memory_space<vmem>>, %arg12: memref<128x128xbf16, #tpu.memory_space<vmem>>, %arg13: memref<128x128xbf16, #tpu.memory_space<vmem>>, %arg14: memref<1x128xf32, #tpu.memory_space<vmem>>, %arg15: memref<128x128xbf16, #tpu.memory_space<vmem>>, %arg16: memref<1x128xf32, #tpu.memory_space<vmem>>, %arg17: memref<128x128xbf16, #tpu.memory_space<vmem>>, %arg18: memref<1x128xf32, #tpu.memory_space<vmem>>, %arg19: memref<8x256xf32, #tpu.memory_space<vmem>>, %arg20: memref<8x128xf32, #tpu.memory_space<vmem>>) attributes {dimension_semantics = [#tpu.dimension_semantics<parallel>], iteration_bounds = array<i64: 1>, scalar_prefetch = 0 : i64, scratch_operands = 0 : i64, tpu.core_type = #tpu.core_type<tc>, window_params = [{transform_indices = @transform_0, window_bounds = array<i64: 8, 128>}, {transform_indices = @transform_1, window_bounds = array<i64: 8, 128>}, {transform_indices = @transform_2, window_bounds = array<i64: 8, 256>}, {transform_indices = @transform_3, window_bounds = array<i64: 8, 128>}, {pipeline_mode = #tpu.pipeline_mode<synchronous>, transform_indices = @transform_4, window_bounds = array<i64: 128, 128>}, {pipeline_mode = #tpu.pipeline_mode<synchronous>, transform_indices = @transform_5, window_bounds = array<i64: 1, 128>}, {pipeline_mode = #tpu.pipeline_mode<synchronous>, transform_indices = @transform_6, window_bounds = array<i64: 128, 128>}, {pipeline_mode = #tpu.pipeline_mode<synchronous>, transform_indices = @transform_7, window_bounds = array<i64: 1, 128>}, {pipeline_mode = #tpu.pipeline_mode<synchronous>, transform_indices = @transform_8, window_bounds = array<i64: 128, 128>}, {pipeline_mode = #tpu.pipeline_mode<synchronous>, transform_indices = @transform_9, window_bounds = array<i64: 1, 128>}, {pipeline_mode = #tpu.pipeline_mode<synchronous>, transform_indices = @transform_10, window_bounds = array<i64: 128, 256>}, {pipeline_mode = #tpu.pipeline_mode<synchronous>, transform_indices = @transform_11, window_bounds = array<i64: 128, 128>}, {pipeline_mode = #tpu.pipeline_mode<synchronous>, transform_indices = @transform_12, window_bounds = array<i64: 128, 128>}, {pipeline_mode = #tpu.pipeline_mode<synchronous>, transform_indices = @transform_13, window_bounds = array<i64: 1, 128>}, {pipeline_mode = #tpu.pipeline_mode<synchronous>, transform_indices = @transform_14, window_bounds = array<i64: 128, 128>}, {pipeline_mode = #tpu.pipeline_mode<synchronous>, transform_indices = @transform_15, window_bounds = array<i64: 1, 128>}, {pipeline_mode = #tpu.pipeline_mode<synchronous>, transform_indices = @transform_16, window_bounds = array<i64: 128, 128>}, {pipeline_mode = #tpu.pipeline_mode<synchronous>, transform_indices = @transform_17, window_bounds = array<i64: 1, 128>}, {transform_indices = @transform_18, window_bounds = array<i64: 8, 256>}, {transform_indices = @transform_19, window_bounds = array<i64: 8, 128>}]} {
    %c0 = arith.constant 0 : index
    %c0_0 = arith.constant 0 : index
    %0 = vector.load %arg1[%c0, %c0_0] : memref<8x128xbf16, #tpu.memory_space<vmem>>, vector<8x128xbf16>
    %c0_1 = arith.constant 0 : index
    %c0_2 = arith.constant 0 : index
    %1 = vector.load %arg5[%c0_1, %c0_2] : memref<128x128xbf16, #tpu.memory_space<vmem>>, vector<128x128xbf16>
    %cst = arith.constant dense<0.000000e+00> : vector<8x128xf32>
    %2 = tpu.matmul %0, %1, %cst {dimension_numbers = #tpu.dot_dimension_numbers<[1], [0], [0], [1], [0, 0, 1, 1], [], []>} : vector<8x128xbf16>, vector<128x128xbf16>, vector<8x128xf32> -> vector<8x128xf32>
    %c0_3 = arith.constant 0 : index
    %c0_4 = arith.constant 0 : index
    %3 = vector.load %arg6[%c0_3, %c0_4] : memref<1x128xf32, #tpu.memory_space<vmem>>, vector<1x128xf32>
    %4 = vector.broadcast %3 : vector<1x128xf32> to vector<8x128xf32>
    %5 = arith.addf %2, %4 : vector<8x128xf32>
    %cst_5 = arith.constant 0.000000e+00 : f32
    %6 = vector.broadcast %cst_5 : f32 to vector<8x128xf32>
    %7 = arith.maximumf %5, %6 : vector<8x128xf32>
    %8 = arith.truncf %7 : vector<8x128xf32> to vector<8x128xbf16>
    %c0_6 = arith.constant 0 : index
    %c0_7 = arith.constant 0 : index
    %9 = vector.load %arg7[%c0_6, %c0_7] : memref<128x128xbf16, #tpu.memory_space<vmem>>, vector<128x128xbf16>
    %cst_8 = arith.constant dense<0.000000e+00> : vector<8x128xf32>
    %10 = tpu.matmul %8, %9, %cst_8 {dimension_numbers = #tpu.dot_dimension_numbers<[1], [0], [0], [1], [0, 0, 1, 1], [], []>} : vector<8x128xbf16>, vector<128x128xbf16>, vector<8x128xf32> -> vector<8x128xf32>
    %c0_9 = arith.constant 0 : index
    %c0_10 = arith.constant 0 : index
    %11 = vector.load %arg8[%c0_9, %c0_10] : memref<1x128xf32, #tpu.memory_space<vmem>>, vector<1x128xf32>
    %12 = vector.broadcast %11 : vector<1x128xf32> to vector<8x128xf32>
    %13 = arith.addf %10, %12 : vector<8x128xf32>
    %cst_11 = arith.constant 0.000000e+00 : f32
    %14 = vector.broadcast %cst_11 : f32 to vector<8x128xf32>
    %15 = arith.maximumf %13, %14 : vector<8x128xf32>
    %16 = arith.truncf %15 : vector<8x128xf32> to vector<8x128xbf16>
    %c0_12 = arith.constant 0 : index
    %c0_13 = arith.constant 0 : index
    %17 = vector.load %arg9[%c0_12, %c0_13] : memref<128x128xbf16, #tpu.memory_space<vmem>>, vector<128x128xbf16>
    %cst_14 = arith.constant dense<0.000000e+00> : vector<8x128xf32>
    %18 = tpu.matmul %16, %17, %cst_14 {dimension_numbers = #tpu.dot_dimension_numbers<[1], [0], [0], [1], [0, 0, 1, 1], [], []>} : vector<8x128xbf16>, vector<128x128xbf16>, vector<8x128xf32> -> vector<8x128xf32>
    %c0_15 = arith.constant 0 : index
    %c0_16 = arith.constant 0 : index
    %19 = vector.load %arg10[%c0_15, %c0_16] : memref<1x128xf32, #tpu.memory_space<vmem>>, vector<1x128xf32>
    %20 = vector.broadcast %19 : vector<1x128xf32> to vector<8x128xf32>
    %21 = arith.addf %18, %20 : vector<8x128xf32>
    %cst_17 = arith.constant 0.000000e+00 : f32
    %22 = vector.broadcast %cst_17 : f32 to vector<8x128xf32>
    %23 = arith.maximumf %21, %22 : vector<8x128xf32>
    %24 = arith.truncf %23 : vector<8x128xf32> to vector<8x128xbf16>
    %c0_18 = arith.constant 0 : index
    %c0_19 = arith.constant 0 : index
    %25 = vector.load %arg11[%c0_18, %c0_19] : memref<128x256xbf16, #tpu.memory_space<vmem>>, vector<128x256xbf16>
    %cst_20 = arith.constant dense<0.000000e+00> : vector<8x256xf32>
    %26 = tpu.matmul %24, %25, %cst_20 {dimension_numbers = #tpu.dot_dimension_numbers<[1], [0], [0], [1], [0, 0, 1, 1], [], []>} : vector<8x128xbf16>, vector<128x256xbf16>, vector<8x256xf32> -> vector<8x256xf32>
    %c0_21 = arith.constant 0 : index
    %c0_22 = arith.constant 0 : index
    %27 = vector.load %arg3[%c0_21, %c0_22] : memref<8x256xf32, #tpu.memory_space<vmem>>, vector<8x256xf32>
    %28 = arith.addf %26, %27 : vector<8x256xf32>
    %29 = vector.extract_strided_slice %28 {offsets = [0, 0], sizes = [8, 128], strides = [1, 1]} : vector<8x256xf32> to vector<8x128xf32>
    %30 = vector.extract_strided_slice %28 {offsets = [0, 128], sizes = [8, 128], strides = [1, 1]} : vector<8x256xf32> to vector<8x128xf32>
    %c0_23 = arith.constant 0 : index
    %c0_24 = arith.constant 0 : index
    %31 = vector.load %arg2[%c0_23, %c0_24] : memref<8x128xf32, #tpu.memory_space<vmem>>, vector<8x128xf32>
    %cst_25 = arith.constant 5.000000e-01 : f32
    %32 = vector.broadcast %cst_25 : f32 to vector<8x128xf32>
    %33 = arith.mulf %32, %30 : vector<8x128xf32>
    %34 = math.exp %33 : vector<8x128xf32>
    %35 = arith.mulf %31, %34 : vector<8x128xf32>
    %36 = arith.addf %35, %29 : vector<8x128xf32>
    %37 = arith.truncf %36 : vector<8x128xf32> to vector<8x128xbf16>
    %c0_26 = arith.constant 0 : index
    %c0_27 = arith.constant 0 : index
    %38 = vector.load %arg12[%c0_26, %c0_27] : memref<128x128xbf16, #tpu.memory_space<vmem>>, vector<128x128xbf16>
    %cst_28 = arith.constant dense<0.000000e+00> : vector<8x128xf32>
    %39 = tpu.matmul %37, %38, %cst_28 {dimension_numbers = #tpu.dot_dimension_numbers<[1], [0], [0], [1], [0, 0, 1, 1], [], []>} : vector<8x128xbf16>, vector<128x128xbf16>, vector<8x128xf32> -> vector<8x128xf32>
    %c0_29 = arith.constant 0 : index
    %c0_30 = arith.constant 0 : index
    %40 = vector.load %arg4[%c0_29, %c0_30] : memref<8x128xf32, #tpu.memory_space<vmem>>, vector<8x128xf32>
    %41 = arith.addf %39, %40 : vector<8x128xf32>
    %cst_31 = arith.constant 0.000000e+00 : f32
    %42 = vector.broadcast %cst_31 : f32 to vector<8x128xf32>
    %43 = arith.maximumf %41, %42 : vector<8x128xf32>
    %44 = arith.truncf %43 : vector<8x128xf32> to vector<8x128xbf16>
    %c0_32 = arith.constant 0 : index
    %c0_33 = arith.constant 0 : index
    %45 = vector.load %arg13[%c0_32, %c0_33] : memref<128x128xbf16, #tpu.memory_space<vmem>>, vector<128x128xbf16>
    %cst_34 = arith.constant dense<0.000000e+00> : vector<8x128xf32>
    %46 = tpu.matmul %44, %45, %cst_34 {dimension_numbers = #tpu.dot_dimension_numbers<[1], [0], [0], [1], [0, 0, 1, 1], [], []>} : vector<8x128xbf16>, vector<128x128xbf16>, vector<8x128xf32> -> vector<8x128xf32>
    %c0_35 = arith.constant 0 : index
    %c0_36 = arith.constant 0 : index
    %47 = vector.load %arg14[%c0_35, %c0_36] : memref<1x128xf32, #tpu.memory_space<vmem>>, vector<1x128xf32>
    %48 = vector.broadcast %47 : vector<1x128xf32> to vector<8x128xf32>
    %49 = arith.addf %46, %48 : vector<8x128xf32>
    %cst_37 = arith.constant 0.000000e+00 : f32
    %50 = vector.broadcast %cst_37 : f32 to vector<8x128xf32>
    %51 = arith.maximumf %49, %50 : vector<8x128xf32>
    %52 = arith.truncf %51 : vector<8x128xf32> to vector<8x128xbf16>
    %c0_38 = arith.constant 0 : index
    %c0_39 = arith.constant 0 : index
    %53 = vector.load %arg15[%c0_38, %c0_39] : memref<128x128xbf16, #tpu.memory_space<vmem>>, vector<128x128xbf16>
    %cst_40 = arith.constant dense<0.000000e+00> : vector<8x128xf32>
    %54 = tpu.matmul %52, %53, %cst_40 {dimension_numbers = #tpu.dot_dimension_numbers<[1], [0], [0], [1], [0, 0, 1, 1], [], []>} : vector<8x128xbf16>, vector<128x128xbf16>, vector<8x128xf32> -> vector<8x128xf32>
    %c0_41 = arith.constant 0 : index
    %c0_42 = arith.constant 0 : index
    %55 = vector.load %arg16[%c0_41, %c0_42] : memref<1x128xf32, #tpu.memory_space<vmem>>, vector<1x128xf32>
    %56 = vector.broadcast %55 : vector<1x128xf32> to vector<8x128xf32>
    %57 = arith.addf %54, %56 : vector<8x128xf32>
    %cst_43 = arith.constant 0.000000e+00 : f32
    %58 = vector.broadcast %cst_43 : f32 to vector<8x128xf32>
    %59 = arith.maximumf %57, %58 : vector<8x128xf32>
    %60 = arith.truncf %59 : vector<8x128xf32> to vector<8x128xbf16>
    %c0_44 = arith.constant 0 : index
    %c0_45 = arith.constant 0 : index
    %61 = vector.load %arg17[%c0_44, %c0_45] : memref<128x128xbf16, #tpu.memory_space<vmem>>, vector<128x128xbf16>
    %cst_46 = arith.constant dense<0.000000e+00> : vector<8x128xf32>
    %62 = tpu.matmul %60, %61, %cst_46 {dimension_numbers = #tpu.dot_dimension_numbers<[1], [0], [0], [1], [0, 0, 1, 1], [], []>} : vector<8x128xbf16>, vector<128x128xbf16>, vector<8x128xf32> -> vector<8x128xf32>
    %c0_47 = arith.constant 0 : index
    %c0_48 = arith.constant 0 : index
    %63 = vector.load %arg18[%c0_47, %c0_48] : memref<1x128xf32, #tpu.memory_space<vmem>>, vector<1x128xf32>
    %64 = vector.broadcast %63 : vector<1x128xf32> to vector<8x128xf32>
    %65 = arith.addf %62, %64 : vector<8x128xf32>
    %66 = math.absf %65 : vector<8x128xf32>
    %cst_49 = arith.constant 0.000000e+00 : f32
    %67 = vector.broadcast %cst_49 : f32 to vector<8x128xf32>
    %68 = arith.subf %67, %66 : vector<8x128xf32>
    %69 = math.exp %68 : vector<8x128xf32>
    %cst_50 = arith.constant 1.000000e+00 : f32
    %70 = vector.broadcast %cst_50 : f32 to vector<8x128xf32>
    %71 = arith.addf %70, %69 : vector<8x128xf32>
    %72 = tpu.reciprocal %71 {approx = true} : vector<8x128xf32> -> vector<8x128xf32>
    %cst_51 = arith.constant 0.000000e+00 : f32
    %73 = vector.broadcast %cst_51 : f32 to vector<8x128xf32>
    %74 = arith.cmpf oge, %65, %73 : vector<8x128xf32>
    %75 = arith.mulf %69, %72 : vector<8x128xf32>
    %76 = arith.select %74, %72, %75 : vector<8x128xi1>, vector<8x128xf32>
    %c0_52 = arith.constant 0 : index
    %c0_53 = arith.constant 0 : index
    %77 = vector.load %arg19[%c0_52, %c0_53] : memref<8x256xf32, #tpu.memory_space<vmem>>, vector<8x256xf32>
    tpu.vector_store %arg19[%c0_52, %c0_53], %28 {strides = array<i32>} : memref<8x256xf32, #tpu.memory_space<vmem>>, vector<8x256xf32>,
    %c0_54 = arith.constant 0 : index
    %c0_55 = arith.constant 0 : index
    %78 = vector.load %arg20[%c0_54, %c0_55] : memref<8x128xf32, #tpu.memory_space<vmem>>, vector<8x128xf32>
    tpu.vector_store %arg20[%c0_54, %c0_55], %76 {strides = array<i32>} : memref<8x128xf32, #tpu.memory_space<vmem>>, vector<8x128xf32>,
    return
  }
  func.func @transform_0(%arg0: i32) -> (i32, i32) {
    %c0_i32 = arith.constant 0 : i32
    %c0_i32_0 = arith.constant 0 : i32
    return %arg0, %c0_i32 : i32, i32
  }
  func.func @transform_1(%arg0: i32) -> (i32, i32) {
    %c0_i32 = arith.constant 0 : i32
    %c0_i32_0 = arith.constant 0 : i32
    return %arg0, %c0_i32 : i32, i32
  }
  func.func @transform_2(%arg0: i32) -> (i32, i32) {
    %c0_i32 = arith.constant 0 : i32
    %c0_i32_0 = arith.constant 0 : i32
    return %arg0, %c0_i32 : i32, i32
  }
  func.func @transform_3(%arg0: i32) -> (i32, i32) {
    %c0_i32 = arith.constant 0 : i32
    %c0_i32_0 = arith.constant 0 : i32
    return %arg0, %c0_i32 : i32, i32
  }
  func.func @transform_4(%arg0: i32) -> (i32, i32) {
    %c0_i32 = arith.constant 0 : i32
    %c0_i32_0 = arith.constant 0 : i32
    %c0_i32_1 = arith.constant 0 : i32
    return %c0_i32, %c0_i32_0 : i32, i32
  }
  func.func @transform_5(%arg0: i32) -> (i32, i32) {
    %c0_i32 = arith.constant 0 : i32
    %c0_i32_0 = arith.constant 0 : i32
    %c0_i32_1 = arith.constant 0 : i32
    return %c0_i32, %c0_i32_0 : i32, i32
  }
  func.func @transform_6(%arg0: i32) -> (i32, i32) {
    %c0_i32 = arith.constant 0 : i32
    %c0_i32_0 = arith.constant 0 : i32
    %c0_i32_1 = arith.constant 0 : i32
    return %c0_i32, %c0_i32_0 : i32, i32
  }
  func.func @transform_7(%arg0: i32) -> (i32, i32) {
    %c0_i32 = arith.constant 0 : i32
    %c0_i32_0 = arith.constant 0 : i32
    %c0_i32_1 = arith.constant 0 : i32
    return %c0_i32, %c0_i32_0 : i32, i32
  }
  func.func @transform_8(%arg0: i32) -> (i32, i32) {
    %c0_i32 = arith.constant 0 : i32
    %c0_i32_0 = arith.constant 0 : i32
    %c0_i32_1 = arith.constant 0 : i32
    return %c0_i32, %c0_i32_0 : i32, i32
  }
  func.func @transform_9(%arg0: i32) -> (i32, i32) {
    %c0_i32 = arith.constant 0 : i32
    %c0_i32_0 = arith.constant 0 : i32
    %c0_i32_1 = arith.constant 0 : i32
    return %c0_i32, %c0_i32_0 : i32, i32
  }
  func.func @transform_10(%arg0: i32) -> (i32, i32) {
    %c0_i32 = arith.constant 0 : i32
    %c0_i32_0 = arith.constant 0 : i32
    %c0_i32_1 = arith.constant 0 : i32
    return %c0_i32, %c0_i32_0 : i32, i32
  }
  func.func @transform_11(%arg0: i32) -> (i32, i32) {
    %c0_i32 = arith.constant 0 : i32
    %c0_i32_0 = arith.constant 0 : i32
    %c0_i32_1 = arith.constant 0 : i32
    return %c0_i32, %c0_i32_0 : i32, i32
  }
  func.func @transform_12(%arg0: i32) -> (i32, i32) {
    %c0_i32 = arith.constant 0 : i32
    %c0_i32_0 = arith.constant 0 : i32
    %c0_i32_1 = arith.constant 0 : i32
    return %c0_i32, %c0_i32_0 : i32, i32
  }
  func.func @transform_13(%arg0: i32) -> (i32, i32) {
    %c0_i32 = arith.constant 0 : i32
    %c0_i32_0 = arith.constant 0 : i32
    %c0_i32_1 = arith.constant 0 : i32
    return %c0_i32, %c0_i32_0 : i32, i32
  }
  func.func @transform_14(%arg0: i32) -> (i32, i32) {
    %c0_i32 = arith.constant 0 : i32
    %c0_i32_0 = arith.constant 0 : i32
    %c0_i32_1 = arith.constant 0 : i32
    return %c0_i32, %c0_i32_0 : i32, i32
  }
  func.func @transform_15(%arg0: i32) -> (i32, i32) {
    %c0_i32 = arith.constant 0 : i32
    %c0_i32_0 = arith.constant 0 : i32
    %c0_i32_1 = arith.constant 0 : i32
    return %c0_i32, %c0_i32_0 : i32, i32
  }
  func.func @transform_16(%arg0: i32) -> (i32, i32) {
    %c0_i32 = arith.constant 0 : i32
    %c0_i32_0 = arith.constant 0 : i32
    %c0_i32_1 = arith.constant 0 : i32
    return %c0_i32, %c0_i32_0 : i32, i32
  }
  func.func @transform_17(%arg0: i32) -> (i32, i32) {
    %c0_i32 = arith.constant 0 : i32
    %c0_i32_0 = arith.constant 0 : i32
    %c0_i32_1 = arith.constant 0 : i32
    return %c0_i32, %c0_i32_0 : i32, i32
  }
  func.func @transform_18(%arg0: i32) -> (i32, i32) {
    %c0_i32 = arith.constant 0 : i32
    %c0_i32_0 = arith.constant 0 : i32
    return %arg0, %c0_i32 : i32, i32
  }
  func.func @transform_19(%arg0: i32) -> (i32, i32) {
    %c0_i32 = arith.constant 0 : i32
    %c0_i32_0 = arith.constant 0 : i32
    return %arg0, %c0_i32 : i32, i32
  }
}

</mosaic_0001>

<bundles_post_ra>
// kernel: tpu_custom_call.1
= control target key start
LH: loop header
LB: loop body
LE: loop exit
PB: predicated region body
PF: predicated region fallthrough
CT: control target
= control target key end

     0   :  { %s1944_s0 = inlined_call_operand.hbm [shape: bf16[8,128], index: 0, kind: input, shape index: {}]   ;;  %s1945_s1 = inlined_call_operand.hbm [shape: f32[8,128], index: 1, kind: input, shape index: {}]   ;;  %s1946_s2 = inlined_call_operand.hbm [shape: f32[8,256], index: 2, kind: input, shape index: {}]   ;;  %s1947_s3 = inlined_call_operand.hbm [shape: f32[8,128], index: 3, kind: input, shape index: {}]   ;;  %s1948_s4 = inlined_call_operand.hbm [shape: bf16[128,128], index: 4, kind: input, shape index: {}]   ;;  %s1949_s5 = inlined_call_operand.vmem [shape: f32[1,128], index: 5, kind: input, shape index: {}]   ;;  %s1950_s6 = inlined_call_operand.hbm [shape: bf16[128,128], index: 6, kind: input, shape index: {}]   ;;  %s1951_s7 = inlined_call_operand.vmem [shape: f32[1,128], index: 7, kind: input, shape index: {}]   ;;  %s1952_s8 = inlined_call_operand.hbm [shape: bf16[128,128], index: 8, kind: input, shape index: {}]   ;;  %s1953_s9 = inlined_call_operand.vmem [shape: f32[1,128], index: 9, kind: input, shape index: {}]   ;;  %s1954_s10 = inlined_call_operand.hbm [shape: bf16[128,256], index: 10, kind: input, shape index: {}]   ;;  %s1955_s11 = inlined_call_operand.hbm [shape: bf16[128,128], index: 11, kind: input, shape index: {}]   ;;  %s1956_s12 = inlined_call_operand.hbm [shape: bf16[128,128], index: 12, kind: input, shape index: {}]   ;;  %s1957_s13 = inlined_call_operand.vmem [shape: f32[1,128], index: 13, kind: input, shape index: {}]   ;;  %s1958_s14 = inlined_call_operand.hbm [shape: bf16[128,128], index: 14, kind: input, shape index: {}]   ;;  %s1959_s15 = inlined_call_operand.vmem [shape: f32[1,128], index: 15, kind: input, shape index: {}]   ;;  %s1960_s16 = inlined_call_operand.hbm [shape: bf16[128,128], index: 16, kind: input, shape index: {}]   ;;  %s1961_s17 = inlined_call_operand.vmem [shape: f32[1,128], index: 17, kind: input, shape index: {}]   ;;  %s1962_s18 = inlined_call_operand.hbm [shape: f32[8,256], index: 18, kind: output, shape index: {0}]   ;;  %s1963_s19 = inlined_call_operand.hbm [shape: f32[8,128], index: 19, kind: output, shape index: {1}]  }
   0x1   :  { %1964 = sst [smem:[#allocation34_spill]] %s1944_s0 }
   0x2   :  { %1965 = sst [smem:[#allocation35_spill]] %s1945_s1 }
   0x3   :  { %1966 = sst [smem:[#allocation36_spill]] %s1946_s2 }
   0x4   :  { %1967 = sst [smem:[#allocation37_spill]] %s1947_s3 }
   0x5   :  { %1968 = sst [smem:[#allocation38_spill]] %s1963_s19 }
   0x6   :  { %25 = vsyncpa [#allocation3], 0 }
   0x7   :  { %26 = vsyncpa [#allocation6], 0 }
   0x8   :  { %27 = vsyncpa [#allocation9], 0 }
   0x9   :  { %28 = vsyncpa [#allocation12], 0 }
   0xa   :  { %29 = vsyncpa [#allocation15], 0 }
   0xb   :  { %30 = vsyncpa [#allocation18], 0 }
   0xc   :  { %31 = vsyncpa [#allocation21], 0 }
   0xd   :  { %32 = vsyncpa [#allocation4], 0  ;;  %s1969_s20 = sld [smem:[#allocation35_spill]] }
  0x13   :  { %s50_s21 = sshll.u32 %s1969_s20, 4  ;;  %s51_s21 = int_to_ptr.hbm [resolvable:$true] %s50_s21 }
  0x14   :  { %33 = vsyncpa [#allocation24], 0  ;;  %s1745_s1 = smov [#allocation5]   ;;  %s1970_s24 = sld [smem:[#allocation37_spill]] }
  0x15   :  { %s52_s22 = sshll.u32 %s1745_s1, 4  ;;  %s1746_s3 = smov [#allocation8]   ;;  %s53_s22 = int_to_ptr.vmem [resolvable:$true] %s52_s22 }
  0x16   :  { %55 = dma.hbm_to_vmem [thread:$0]  %s51_s21, 128, %s53_s22, [#allocation6]  }
  0x17   :  { %s74_s26 = sshll.u32 %s1746_s3, 4  ;;  %s97_s29 = sshll.u32 %s1950_s6, 4  ;;  %s75_s26 = int_to_ptr.vmem [resolvable:$true] %s74_s26  ;;  %s98_s29 = int_to_ptr.hbm [resolvable:$true] %s97_s29 }
  0x18   :  { %s1747_s0 = smov [#allocation11]   ;;  %s127_s19 = sshll.u32 %s1954_s10, 4  ;;  %s128_s19 = int_to_ptr.hbm [resolvable:$true] %s127_s19 }
  0x19   :  { %s99_s30 = sshll.u32 %s1747_s0, 4  ;;  %s1748_s2 = smov 64   ;;  %s100_s30 = int_to_ptr.vmem [resolvable:$true] %s99_s30 }
  0x1a   :  { %s72_s25 = sshll.u32 %s1970_s24, 4  ;;  %s1749_s23 = smov 4   ;;  %s73_s25 = int_to_ptr.hbm [resolvable:$true] %s72_s25 }
  0x1b   :  { %77 = dma.hbm_to_vmem [thread:$0]  %s73_s25, 128, %s75_s26, [#allocation9]  }
  0x1c   :  { %105 = dma.hbm_to_vmem [thread:$0]  %s98_s29, 1024, %s100_s30, [#allocation12], %s1748_s2, %s1748_s2, %s1749_s23  }
  0x1d   :  { %s1750_s21 = smov [#allocation14]   ;;  %s1751_s24 = smov 128  }
  0x1e   :  { %s129_s22 = sshll.u32 %s1750_s21, 4  ;;  %s1752_s6 = smov 8   ;;  %s130_s22 = int_to_ptr.vmem [resolvable:$true] %s129_s22 }
  0x1f   :  { %135 = dma.hbm_to_vmem [thread:$0]  %s128_s19, 2048, %s130_s22, [#allocation15], %s1751_s24, %s1751_s24, %s1752_s6  }
  0x20   :  { %s153_s26 = sshll.u32 %s1956_s12, 4  ;;  %s1753_s27 = smov [#allocation17]   ;;  %s154_s26 = int_to_ptr.hbm [resolvable:$true] %s153_s26 }
  0x21   :  { %s155_s10 = sshll.u32 %s1753_s27, 4  ;;  %s1971_s20 = sld [smem:[#allocation34_spill]]  ;;  %s156_s10 = int_to_ptr.vmem [resolvable:$true] %s155_s10 }
  0x22   :  { %161 = dma.hbm_to_vmem [thread:$0]  %s154_s26, 1024, %s156_s10, [#allocation18], %s1748_s2, %s1748_s2, %s1749_s23  }
  0x23   :  { %s1754_s29 = smov [#allocation2]   ;;  %s1972_s22 = sld [smem:[#allocation36_spill]] }
  0x24   :  { %s41_s30 = sshll.u32 %s1754_s29, 4  ;;  %s82_s25 = sshll.u32 %s1948_s4, 4  ;;  %s42_s30 = int_to_ptr.vmem [resolvable:$true] %s41_s30  ;;  %s83_s25 = int_to_ptr.hbm [resolvable:$true] %s82_s25 }
  0x25   :  { %s1755_s3 = smov [#allocation7]   ;;  %s1756_s26 = smov [#allocation10]  }
  0x26   :  { %s63_s27 = sshll.u32 %s1755_s3, 4  ;;  %s84_s10 = sshll.u32 %s1756_s26, 4  ;;  %s64_s27 = int_to_ptr.vmem [resolvable:$true] %s63_s27  ;;  %s85_s10 = int_to_ptr.vmem [resolvable:$true] %s84_s10 }
  0x27   :  { %s39_s1 = sshll.u32 %s1971_s20, 4  ;;  %s112_s20 = sshll.u32 %s1952_s8, 4  ;;  %s40_s1 = int_to_ptr.hbm [resolvable:$true] %s39_s1  ;;  %s113_s20 = int_to_ptr.hbm [resolvable:$true] %s112_s20 }
  0x28   :  { %44 = dma.hbm_to_vmem [thread:$0]  %s40_s1, 64, %s42_s30, [#allocation3]  }
  0x29   :  { %s61_s24 = sshll.u32 %s1972_s22, 4  ;;  %s140_s4 = sshll.u32 %s1955_s11, 4  ;;  %s62_s24 = int_to_ptr.hbm [resolvable:$true] %s61_s24  ;;  %s141_s4 = int_to_ptr.hbm [resolvable:$true] %s140_s4 }
  0x2a   :  { %66 = dma.hbm_to_vmem [thread:$0]  %s62_s24, 256, %s64_s27, [#allocation6]  }
  0x2b   :  { %90 = dma.hbm_to_vmem [thread:$0]  %s83_s25, 1024, %s85_s10, [#allocation9], %s1748_s2, %s1748_s2, %s1749_s23  }
  0x2c   :  { %s1757_s30 = smov [#allocation13]   ;;  %s1758_s21 = smov [#allocation16]  }
  0x2d   :  { %s114_s19 = sshll.u32 %s1757_s30, 4  ;;  %s142_s8 = sshll.u32 %s1758_s21, 4  ;;  %s115_s19 = int_to_ptr.vmem [resolvable:$true] %s114_s19  ;;  %s143_s8 = int_to_ptr.vmem [resolvable:$true] %s142_s8 }
  0x2e   :  { %120 = dma.hbm_to_vmem [thread:$0]  %s113_s20, 1024, %s115_s19, [#allocation12], %s1748_s2, %s1748_s2, %s1749_s23  }
  0x2f   :  { %s168_s12 = sshll.u32 %s1958_s14, 4  ;;  %s183_s25 = sshll.u32 %s1960_s16, 4  ;;  %s169_s12 = int_to_ptr.hbm [resolvable:$true] %s168_s12  ;;  %s184_s25 = int_to_ptr.hbm [resolvable:$true] %s183_s25 }
  0x30   :  { %148 = dma.hbm_to_vmem [thread:$0]  %s141_s4, 1024, %s143_s8, [#allocation15], %s1748_s2, %s1748_s2, %s1749_s23  }
  0x31   :  { %s1759_s3 = smov [#allocation19]   ;;  %s1760_s26 = smov [#allocation20]  }
  0x32   :  { %s170_s27 = sshll.u32 %s1759_s3, 4  ;;  %s185_s14 = sshll.u32 %s1760_s26, 4  ;;  %s171_s27 = int_to_ptr.vmem [resolvable:$true] %s170_s27  ;;  %s186_s14 = int_to_ptr.vmem [resolvable:$true] %s185_s14 }
  0x33   :  { %176 = dma.hbm_to_vmem [thread:$0]  %s169_s12, 1024, %s171_s27, [#allocation18], %s1748_s2, %s1748_s2, %s1749_s23  }
  0x34   :  { %191 = dma.hbm_to_vmem [thread:$0]  %s184_s25, 1024, %s186_s14, [#allocation21], %s1748_s2, %s1748_s2, %s1749_s23  }
  0x35   :  { %1727 = dma.done.wait [#allocation3], 64  }
  0x36   :  { %1728 = vsyncadd [#allocation3], 4294967232 }
  0x37   :  { %1729 = dma.done.wait [#allocation6], 384  }
  0x38   :  { %1730 = vsyncadd [#allocation6], 4294966912 }
  0x39   :  { %1731 = dma.done.wait [#allocation9], 1152  }
  0x3a   :  { %1732 = vsyncadd [#allocation9], 4294966144 }
  0x3b   :  { %1733 = dma.done.wait [#allocation12], 2048  }
  0x3c   :  { %1734 = vsyncadd [#allocation12], 4294965248 }
  0x3d   :  { %1735 = dma.done.wait [#allocation15], 3072  }
  0x3e   :  { %1736 = vsyncadd [#allocation15], 4294964224 }
  0x3f   :  { %1737 = dma.done.wait [#allocation18], 2048  }
  0x40   :  { %1738 = vsyncadd [#allocation18], 4294965248 }
  0x41   :  { %1739 = dma.done.wait [#allocation21], 1024  }
  0x42   :  { %1740 = vsyncadd [#allocation21], 4294966272  ;;  %v1296_v0 = vld [vmem:[#allocation10 + $0x38] sm:$0xff]  ;;  %v1295_v1 = vld [vmem:[#allocation10 + $0x30] sm:$0xff]  ;;  %s969_s29 = sshll.u32 %s1962_s18, 4  ;;  %s1761_s4 = smov [#allocation22]   ;;  %s970_s29 = int_to_ptr.hbm [resolvable:$true] %s969_s29 }
  0x43   :  { %311 = vmatpush.bf16.msra.mxu0 %v1296_v0  ;;  %v1304_v2 = vld [vmem:[#allocation11 + $0x38] sm:$0xff]  ;;  %v1294_v3 = vld [vmem:[#allocation10 + $0x28] sm:$0xff]  ;;  %v1303_v4 = vld [vmem:[#allocation11 + $0x30] sm:$0xff]  ;;  %s967_s30 = sshll.u32 %s1761_s4, 4  ;;  %s1973_s24 = sld [smem:[#allocation38_spill]]  ;;  %s968_s30 = int_to_ptr.vmem [resolvable:$true] %s967_s30 }
  0x44   :  { %394 = vmatpush.bf16.msra.mxu1 %v1304_v2  ;;  %v1302_v5 = vld [vmem:[#allocation11 + $0x28] sm:$0xff]  ;;  %v1293_v6 = vld [vmem:[#allocation10 + $0x20] sm:$0xff]  ;;  %v1292_v8 = vld [vmem:[#allocation10 + $0x18] sm:$0xff] }
  0x45   :  { %v1301_v7 = vld [vmem:[#allocation11 + $0x20] sm:$0xff]  ;;  %v1300_v9 = vld [vmem:[#allocation11 + $0x18] sm:$0xff]  ;;  %v1291_v10 = vld [vmem:[#allocation10 + $0x10] sm:$0xff] }
  0x46   :  { %v1299_v11 = vld [vmem:[#allocation11 + $0x10] sm:$0xff]  ;;  %v1290_v12 = vld [vmem:[#allocation10 + $0x8] sm:$0xff]  ;;  %v1289_v13 = vld [vmem:[#allocation10] sm:$0xff] }
  0x47   :  { %312 = vmatpush.bf16.msra.mxu0 %v1295_v1  ;;  %v242_v14 = vld [vmem:[#allocation2] sm:$0xf]  ;;  %v1298_v15 = vld [vmem:[#allocation11 + $0x8] sm:$0xff]  ;;  %v1297_v16 = vld [vmem:[#allocation11] sm:$0xff] }
  0x48   :  { %395 = vmatpush.bf16.msra.mxu1 %v1303_v4  ;;  %v1312_v17 = vld [vmem:[#allocation13 + $0x38] sm:$0xff]  ;;  %v1311_v18 = vld [vmem:[#allocation13 + $0x30] sm:$0xff]  ;;  %v1310_v19 = vld [vmem:[#allocation13 + $0x28] sm:$0xff] }
  0x49   :  { %477 = vmatpush.bf16.msra.mxu2 %v1312_v17  ;;  %v1309_v20 = vld [vmem:[#allocation13 + $0x20] sm:$0xff]  ;;  %v1308_v21 = vld [vmem:[#allocation13 + $0x18] sm:$0xff]  ;;  %v1307_v22 = vld [vmem:[#allocation13 + $0x10] sm:$0xff]  ;;  %s980_s12 = sshll.u32 %s1973_s24, 4  ;;  %s981_s12 = int_to_ptr.hbm [resolvable:$true] %s980_s12 }
  0x4a   :  { %v1379_v23 = vld [vmem:[%s1949_s5] ss:$0 sm:$0xff]  ;;  %v1306_v29 = vld [vmem:[#allocation13 + $0x8] sm:$0xff]  ;;  %v1305_v30 = vld [vmem:[#allocation13] sm:$0xff] }
  0x4b   :  { %313 = vmatpush.bf16.msra.mxu0 %v1294_v3  ;;  %v1155_v31 = vld [vmem:[#allocation14 + $0x70] sm:$0xf]  ;;  %v1328_v32 = vld [vmem:[#allocation14 + $0x74] sm:$0xf0]  ;;  %v1327_v33 = vld [vmem:[#allocation14 + $0x74] sm:$0xf] }
  0x4c   :  { %396 = vmatpush.bf16.msra.mxu1 %v1302_v5  ;;  %v1156_v34 = vor.u32 %v1328_v32, %v1155_v31  ;;  %v1157_v35 = vld [vmem:[#allocation14 + $0x78] sm:$0xf0]  ;;  %v1147_v36 = vld [vmem:[#allocation14 + $0x60] sm:$0xf]  ;;  %v1326_v37 = vld [vmem:[#allocation14 + $0x64] sm:$0xf0] }
  0x4d   :  { %478 = vmatpush.bf16.msra.mxu2 %v1311_v18  ;;  %v1160_v38 = vor.u32 %v1327_v33, %v1157_v35  ;;  %v1325_v39 = vld [vmem:[#allocation14 + $0x64] sm:$0xf]  ;;  %v1149_v40 = vld [vmem:[#allocation14 + $0x68] sm:$0xf0]  ;;  %v1148_v41 = vor.u32 %v1326_v37, %v1147_v36  ;;  %v1139_v43 = vld [vmem:[#allocation14 + $0x50] sm:$0xf] }
  0x4e   :  { %590 = vmatpush.bf16.msra.mxu3 %v1156_v34  ;;  %v1152_v42 = vor.u32 %v1325_v39, %v1149_v40  ;;  %v1324_v44 = vld [vmem:[#allocation14 + $0x54] sm:$0xf0]  ;;  %v1323_v45 = vld [vmem:[#allocation14 + $0x54] sm:$0xf]  ;;  %v1141_v46 = vld [vmem:[#allocation14 + $0x58] sm:$0xf0] }
  0x4f   :  { %314 = vmatpush.bf16.msra.mxu0 %v1293_v6  ;;  %v1140_v47 = vor.u32 %v1324_v44, %v1139_v43  ;;  %v1144_v48 = vor.u32 %v1323_v45, %v1141_v46  ;;  %v1131_v49 = vld [vmem:[#allocation14 + $0x40] sm:$0xf]  ;;  %v1322_v50 = vld [vmem:[#allocation14 + $0x44] sm:$0xf0]  ;;  %v1321_v51 = vld [vmem:[#allocation14 + $0x44] sm:$0xf] }
  0x50   :  { %397 = vmatpush.bf16.msra.mxu1 %v1301_v7  ;;  %v1133_v52 = vld [vmem:[#allocation14 + $0x48] sm:$0xf0]  ;;  %v1132_v53 = vor.u32 %v1322_v50, %v1131_v49  ;;  %v1123_v55 = vld [vmem:[#allocation14 + $0x30] sm:$0xf]  ;;  %v1320_v56 = vld [vmem:[#allocation14 + $0x34] sm:$0xf0] }
  0x51   :  { %479 = vmatpush.bf16.msra.mxu2 %v1310_v19  ;;  %v1136_v54 = vor.u32 %v1321_v51, %v1133_v52  ;;  %v1319_v57 = vld [vmem:[#allocation14 + $0x34] sm:$0xf]  ;;  %v1125_v58 = vld [vmem:[#allocation14 + $0x38] sm:$0xf0]  ;;  %v1124_v59 = vor.u32 %v1320_v56, %v1123_v55  ;;  %v1115_v61 = vld [vmem:[#allocation14 + $0x20] sm:$0xf] }
  0x52   :  { %591 = vmatpush.bf16.msra.mxu3 %v1148_v41  ;;  %v1128_v60 = vor.u32 %v1319_v57, %v1125_v58  ;;  %v1318_v62 = vld [vmem:[#allocation14 + $0x24] sm:$0xf0]  ;;  %v1317_v63 = vld [vmem:[#allocation14 + $0x24] sm:$0xf]  ;;  %v1117_v0 = vld [vmem:[#allocation14 + $0x28] sm:$0xf0] }
  0x53   :  { %315 = vmatpush.bf16.msra.mxu0 %v1292_v8  ;;  %v1116_v1 = vor.u32 %v1318_v62, %v1115_v61  ;;  %v1120_v2 = vor.u32 %v1317_v63, %v1117_v0  ;;  %v1380_v3 = vld [vmem:[%s1951_s7] ss:$0 sm:$0xff]  ;;  %v1313_v17 = vld [vmem:[#allocation14 + $0x4] sm:$0xf]  ;;  %v1101_v19 = vld [vmem:[#allocation14 + $0x8] sm:$0xf0] }
  0x54   :  { %398 = vmatpush.bf16.msra.mxu1 %v1300_v9  ;;  %v1107_v9 = vld [vmem:[#allocation14 + $0x10] sm:$0xf]  ;;  %v1332_v31 = vld [vmem:[#allocation16 + $0x18] sm:$0xff]  ;;  %v1330_v33 = vld [vmem:[#allocation16 + $0x8] sm:$0xff] }
  0x55   :  { %480 = vmatpush.bf16.msra.mxu2 %v1309_v20  ;;  %v1104_v20 = vor.u32 %v1313_v17, %v1101_v19  ;;  %v1331_v32 = vld [vmem:[#allocation16 + $0x10] sm:$0xff]  ;;  %v1329_v34 = vld [vmem:[#allocation16] sm:$0xff]  ;;  %v1344_v35 = vld [vmem:[#allocation17 + $0x38] sm:$0xff] }
  0x56   :  { %592 = vmatpush.bf16.msra.mxu3 %v1140_v47  ;;  %v1343_v36 = vld [vmem:[#allocation17 + $0x30] sm:$0xff]  ;;  %v1342_v37 = vld [vmem:[#allocation17 + $0x28] sm:$0xff]  ;;  %v1341_v39 = vld [vmem:[#allocation17 + $0x20] sm:$0xff] }
  0x57   :  { %316 = vmatpush.bf16.msra.mxu0 %v1291_v10  ;;  %v1316_v10 = vld [vmem:[#allocation14 + $0x14] sm:$0xf0]  ;;  %v508_v44 = vld [vmem:[#allocation7] sm:$0xff]  ;;  %v1339_v47 = vld [vmem:[#allocation17 + $0x10] sm:$0xff] }
  0x58   :  { %399 = vmatpush.bf16.msra.mxu1 %v1299_v11  ;;  %v1315_v11 = vld [vmem:[#allocation14 + $0x14] sm:$0xf]  ;;  %v616_v50 = vld [vmem:[#allocation5] sm:$0xff]  ;;  %v1338_v56 = vld [vmem:[#allocation17 + $0x8] sm:$0xff] }
  0x59   :  { %481 = vmatpush.bf16.msra.mxu2 %v1308_v21  ;;  %v1336_v21 = vld [vmem:[#allocation16 + $0x38] sm:$0xff]  ;;  %v1337_v57 = vld [vmem:[#allocation17] sm:$0xff]  ;;  %v1347_v63 = vld [vmem:[#allocation19 + $0x10] sm:$0xff] }
  0x5a   :  { %593 = vmatpush.bf16.msra.mxu3 %v1132_v53  ;;  %v1352_v58 = vld [vmem:[#allocation19 + $0x38] sm:$0xff]  ;;  %v1349_v61 = vld [vmem:[#allocation19 + $0x20] sm:$0xff] }
  0x5b   :  { %317 = vmatpush.bf16.msra.mxu0 %v1290_v12  ;;  %v1108_v12 = vor.u32 %v1316_v10, %v1107_v9  ;;  %v1348_v62 = vld [vmem:[#allocation19 + $0x18] sm:$0xff]  ;;  %v1359_v9 = vld [vmem:[#allocation20 + $0x30] sm:$0xff]  ;;  %v1358_v10 = vld [vmem:[#allocation20 + $0x28] sm:$0xff] }
  0x5c   :  { %400 = vmatpush.bf16.msra.mxu1 %v1298_v15  ;;  %v1099_v15 = vld [vmem:[#allocation14] sm:$0xf]  ;;  %v639_v0 = vld [vmem:[#allocation8] sm:$0xff] }
  0x5d   :  { %482 = vmatpush.bf16.msra.mxu2 %v1307_v22  ;;  %v1335_v22 = vld [vmem:[#allocation16 + $0x30] sm:$0xff] }
  0x5e   :  { %594 = vmatpush.bf16.msra.mxu3 %v1124_v59  ;;  %v1351_v59 = vld [vmem:[#allocation19 + $0x30] sm:$0xff] }
  0x5f   :  { %318 = vmatpush.bf16.msra.mxu0 %v1289_v13  ;;  %v1109_v13 = vld [vmem:[#allocation14 + $0x18] sm:$0xf0] }
  0x60   :  { %401 = vmatpush.bf16.msra.mxu1 %v1297_v16  ;;  %v1314_v16 = vld [vmem:[#allocation14 + $0x4] sm:$0xf0] }
  0x61   :  { %483 = vmatpush.bf16.msra.mxu2 %v1306_v29  ;;  %v1100_v18 = vor.u32 %v1314_v16, %v1099_v15 }
  0x62   :  { %319 = vmatmul.bf16.vlgmr.msra.gmra.mxu0 %v242_v14  ;;  %595 = vmatpush.bf16.msra.mxu3 %v1116_v1  ;;  %v1112_v14 = vor.u32 %v1315_v11, %v1109_v13  ;;  %v1357_v11 = vld [vmem:[#allocation20 + $0x20] sm:$0xff]  ;;  %v1355_v13 = vld [vmem:[#allocation20 + $0x10] sm:$0xff] }
  0x63   :  { %603 = vmatpush.bf16.msrb.mxu0 %v1160_v38  ;;  %v509_v38 = vld [vmem:[#allocation7 + $0x8] sm:$0xff] }
  0x64   :  { %688 = vmatpush.bf16.msrb.mxu1 %v1336_v21  ;;  %v1353_v21 = vld [vmem:[#allocation20] sm:$0xff] }
  0x65   :  { %484 = vmatpush.bf16.msra.mxu2 %v1305_v30  ;;  %v1333_v30 = vld [vmem:[#allocation16 + $0x20] sm:$0xff] }
  0x66   :  { %596 = vmatpush.bf16.msra.mxu3 %v1108_v12  ;;  %v1356_v12 = vld [vmem:[#allocation20 + $0x18] sm:$0xff] }
  0x67   :  { %604 = vmatpush.bf16.msrb.mxu0 %v1152_v42  ;;  %v1340_v42 = vld [vmem:[#allocation17 + $0x18] sm:$0xff] }
  0x68   :  { %689 = vmatpush.bf16.msrb.mxu1 %v1335_v22  ;;  %v1383_v22 = vld [vmem:[%s1959_s15] ss:$0 sm:$0xff]  ;;  %s1762_s15 = smov [#allocation23]  }
  0x69   :  { %771 = vmatpush.bf16.msrb.mxu2 %v1344_v35  ;;  %s978_s18 = sshll.u32 %s1762_s15, 4  ;;  %s979_s18 = int_to_ptr.vmem [resolvable:$true] %s978_s18 }
  0x6a   :  { %597 = vmatpush.bf16.msra.mxu3 %v1100_v18 }
  0x6b   :  { %605 = vmatpush.bf16.msrb.mxu0 %v1144_v48 }
  0x6d   :  { %772 = vmatpush.bf16.msrb.mxu2 %v1343_v36 }
  0x6e   :  { %854 = vmatpush.bf16.msrb.mxu3 %v1352_v58 }
  0x6f   :  { %606 = vmatpush.bf16.msrb.mxu0 %v1136_v54 }
  0x71   :  { %773 = vmatpush.bf16.msrb.mxu2 %v1342_v37 }
  0x72   :  { %855 = vmatpush.bf16.msrb.mxu3 %v1351_v59 }
  0x73   :  { %607 = vmatpush.bf16.msrb.mxu0 %v1128_v60  ;;  %v1350_v60 = vld [vmem:[#allocation19 + $0x28] sm:$0xff] }
  0x75   :  { %774 = vmatpush.bf16.msrb.mxu2 %v1341_v39 }
  0x76   :  { %856 = vmatpush.bf16.msrb.mxu3 %v1350_v60 }
  0x77   :  { %608 = vmatpush.bf16.msrb.mxu0 %v1120_v2 }
  0x79   :  { %775 = vmatpush.bf16.msrb.mxu2 %v1340_v42 }
  0x7a   :  { %857 = vmatpush.bf16.msrb.mxu3 %v1349_v61 }
  0x7b   :  { %609 = vmatpush.bf16.msrb.mxu0 %v1112_v14  ;;  %v1382_v14 = vld [vmem:[%s1957_s13] ss:$0 sm:$0xff] }
  0x7d   :  { %776 = vmatpush.bf16.msrb.mxu2 %v1339_v47 }
  0x7e   :  { %858 = vmatpush.bf16.msrb.mxu3 %v1348_v62 }
  0x7f   :  { %610 = vmatpush.bf16.msrb.mxu0 %v1104_v20  ;;  %v1354_v20 = vld [vmem:[#allocation20 + $0x8] sm:$0xff] }
  0x81   :  { %777 = vmatpush.bf16.msrb.mxu2 %v1338_v56 }
  0x82   :  { %859 = vmatpush.bf16.msrb.mxu3 %v1347_v63 }
  0x85   :  { %778 = vmatpush.bf16.msrb.mxu2 %v1337_v57 }
  0xdf   :  { %v320_v24 = vpop.f32.mrf.mxu0 }
  0xe0   :  { %v321_v25 = vadd.f32 %v1379_v23, %v320_v24  ;;  %v1334_v23 = vld [vmem:[#allocation16 + $0x28] sm:$0xff]  ;;  %v1381_v24 = vld [vmem:[%s1953_s9] ss:$0 sm:$0xff] }
  0xe1   :  { %690 = vmatpush.bf16.msrb.mxu1 %v1334_v23 }
  0xe2   :  { %v324_v26 = vmax.f32 %v321_v25, 0.0 }
  0xe4   :  { %v325_v27 = vpack.c.bf16 %v324_v26, %v324_v26 }
  0xe5   :  { %691 = vmatpush.bf16.msrb.mxu1 %v1333_v30 }
  0xe6   :  { %402 = vmatmul.bf16.vlgmr.msra.gmra.mxu1 %v325_v27 }
  0xe7   :  { %v322_v28 = vpop.f32.mrf.mxu0 }
  0xe9   :  { %692 = vmatpush.bf16.msrb.mxu1 %v1332_v31 }
  0xed   :  { %693 = vmatpush.bf16.msrb.mxu1 %v1331_v32 }
  0xf1   :  { %694 = vmatpush.bf16.msrb.mxu1 %v1330_v33 }
  0xf5   :  { %695 = vmatpush.bf16.msrb.mxu1 %v1329_v34 }
 0x163   :  { %v403_v4 = vpop.f32.mrf.mxu1 }
 0x164   :  { %v404_v5 = vadd.f32 %v1380_v3, %v403_v4 }
 0x166   :  { %v407_v6 = vmax.f32 %v404_v5, 0.0 }
 0x168   :  { %v408_v7 = vpack.c.bf16 %v407_v6, %v407_v6  ;;  %v1346_v6 = vld [vmem:[#allocation19 + $0x8] sm:$0xff] }
 0x169   :  { %860 = vmatpush.bf16.msrb.mxu3 %v1346_v6 }
 0x16a   :  { %485 = vmatmul.bf16.vlgmr.msra.gmra.mxu2 %v408_v7  ;;  %v1345_v7 = vld [vmem:[#allocation19] sm:$0xff] }
 0x16b   :  { %v405_v8 = vpop.f32.mrf.mxu1 }
 0x16c   :  { %v1360_v8 = vld [vmem:[#allocation20 + $0x38] sm:$0xff] }
 0x16d   :  { %861 = vmatpush.bf16.msrb.mxu3 %v1345_v7  ;;  %937 = vmatpush.bf16.msra.mxu0 %v1360_v8 }
 0x171   :  { %938 = vmatpush.bf16.msra.mxu0 %v1359_v9 }
 0x175   :  { %939 = vmatpush.bf16.msra.mxu0 %v1358_v10 }
 0x179   :  { %940 = vmatpush.bf16.msra.mxu0 %v1357_v11 }
 0x17d   :  { %941 = vmatpush.bf16.msra.mxu0 %v1356_v12 }
 0x181   :  { %942 = vmatpush.bf16.msra.mxu0 %v1355_v13 }
 0x185   :  { %943 = vmatpush.bf16.msra.mxu0 %v1354_v20 }
 0x189   :  { %944 = vmatpush.bf16.msra.mxu0 %v1353_v21 }
 0x1ed   :  { %v486_v25 = vpop.f32.mrf.mxu2 }
 0x1ee   :  { %v487_v26 = vadd.f32 %v1381_v24, %v486_v25 }
 0x1f0   :  { %v490_v27 = vmax.f32 %v487_v26, 0.0 }
 0x1f2   :  { %v491_v28 = vpack.c.bf16 %v490_v27, %v490_v27 }
 0x1f4   :  { %598 = vmatmul.bf16.vlgmr.msra.gmra.mxu3 %v491_v28  ;;  %611 = vmatmul.bf16.vlgmr.msrb.gmra.mxu0 %v491_v28  ;;  %v1384_v28 = vld [vmem:[%s1961_s17] ss:$0 sm:$0xff] }
 0x1f5   :  { %v488_v29 = vpop.f32.mrf.mxu2 }
 0x271   :  { %v612_v40 = vpop.f32.mrf.mxu0 }
 0x272   :  { %v613_v41 = vadd.f32 %v612_v40, %v509_v38 }
 0x274   :  { %v617_v43 = vmul.f32 0.5, %v613_v41  ;;  %960 = vst [vmem:[#allocation22 + $0x8] sm:$0xff] %v613_v41 }
 0x276   :  { %v618_v45 = vmul.f32 1.442695, %v617_v43 }
 0x277   :  { %v599_v46 = vpop.f32.mrf.mxu3 }
 0x278   :  { %1385 = vpow2.f32 %v618_v45  ;;  %v600_v48 = vadd.f32 %v599_v46, %v508_v44 }
 0x279   :  { %v614_v49 = vpop.f32.mrf.mxu0 }
 0x27a   :  { %959 = vst [vmem:[#allocation22] sm:$0xff] %v600_v48 }
 0x27b   :  { %972 = dma.vmem_to_hbm [thread:$0]  %s968_s30, 256, %s970_s29, [#allocation4]  }
 0x27e   :  { %v1386_v51 = vpop.eup %1385 }
 0x27f   :  { %v620_v52 = vmul.f32 %v1386_v51, %v616_v50  ;;  %v601_v53 = vpop.f32.mrf.mxu3 }
 0x281   :  { %v621_v54 = vadd.f32 %v620_v52, %v600_v48 }
 0x283   :  { %v622_v55 = vpack.c.bf16 %v621_v54, %v621_v54 }
 0x285   :  { %696 = vmatmul.bf16.vlgmr.msrb.gmra.mxu1 %v622_v55 }
 0x302   :  { %v697_v1 = vpop.f32.mrf.mxu1 }
 0x303   :  { %v698_v2 = vadd.f32 %v697_v1, %v639_v0 }
 0x305   :  { %v701_v3 = vmax.f32 %v698_v2, 0.0 }
 0x307   :  { %v702_v4 = vpack.c.bf16 %v701_v3, %v701_v3 }
 0x309   :  { %779 = vmatmul.bf16.vlgmr.msrb.gmra.mxu2 %v702_v4 }
 0x30a   :  { %v699_v5 = vpop.f32.mrf.mxu1 }
 0x38c   :  { %v780_v15 = vpop.f32.mrf.mxu2 }
 0x38d   :  { %v781_v16 = vadd.f32 %v1382_v14, %v780_v15 }
 0x38f   :  { %v784_v17 = vmax.f32 %v781_v16, 0.0 }
 0x391   :  { %v785_v18 = vpack.c.bf16 %v784_v17, %v784_v17 }
 0x393   :  { %862 = vmatmul.bf16.vlgmr.msrb.gmra.mxu3 %v785_v18 }
 0x394   :  { %v782_v19 = vpop.f32.mrf.mxu2 }
 0x416   :  { %v863_v23 = vpop.f32.mrf.mxu3 }
 0x417   :  { %v864_v24 = vadd.f32 %v1383_v22, %v863_v23 }
 0x419   :  { %v867_v25 = vmax.f32 %v864_v24, 0.0 }
 0x41b   :  { %v868_v26 = vpack.c.bf16 %v867_v25, %v867_v25 }
 0x41d   :  { %945 = vmatmul.bf16.vlgmr.msra.gmra.mxu0 %v868_v26 }
 0x41e   :  { %v865_v27 = vpop.f32.mrf.mxu3 }
 0x49a   :  { %v946_v29 = vpop.f32.mrf.mxu0 }
 0x49b   :  { %v947_v30 = vadd.f32 %v1384_v28, %v946_v29 }
 0x49d   :  { %v950_v31 = vand.u32 2147483647, %v947_v30  ;;  %vm956_vm0 = vcmp.ge.f32.partialorder %v947_v30, 0.0 }
 0x49f   :  { %v951_v32 = vsub.f32 0.0, %v950_v31 }
 0x4a1   :  { %v952_v33 = vmul.f32 1.442695, %v951_v32 }
 0x4a2   :  { %v948_v34 = vpop.f32.mrf.mxu0 }
 0x4a3   :  { %1387 = vpow2.f32 %v952_v33 }
 0x4a9   :  { %v1388_v35 = vpop.eup %1387 }
 0x4aa   :  { %v954_v36 = vadd.f32 1.0, %v1388_v35 }
 0x4ac   :  { %1389 = vrcp.f32 %v954_v36 }
 0x4b2   :  { %v1390_v37 = vpop.eup %1389 }
 0x4b3   :  { %v957_v38 = vmul.f32 %v1390_v37, %v1388_v35 }
 0x4b5   :  { %v958_v39 = vsel %vm956_vm0, %v1390_v37, %v957_v38 }
 0x4b6   :  { %961 = vst [vmem:[#allocation23] sm:$0xff] %v958_v39 }
 0x4b7   :  { %983 = dma.vmem_to_hbm [thread:$0]  %s979_s18, 128, %s981_s12, [#allocation24]  }
 0x4b8   :  { %1741 = dma.done.wait [#allocation4], 256  }
 0x4b9   :  { %1742 = vsyncadd [#allocation4], 4294967040 }
 0x4ba   :  { %1743 = dma.done.wait [#allocation24], 128  }
 0x4bb   :  { %1744 = vsyncadd [#allocation24], 4294967168 }
 0x4bc   :  { %992 = vsyncpa [#allocation3], 1 }
 0x4bd   :  { %993 = vsyncpa [#allocation6], 1 }
 0x4be   :  { %994 = vsyncpa [#allocation9], 1 }
 0x4bf   :  { %995 = vsyncpa [#allocation12], 1 }
 0x4c0   :  { %996 = vsyncpa [#allocation15], 1 }
 0x4c1   :  { %997 = vsyncpa [#allocation18], 1 }
 0x4c2   :  { %998 = vsyncpa [#allocation21], 1 }
 0x4c3   :  { %999 = vsyncpa [#allocation4], 1 }
 0x4c4   :  { %1000 = vsyncpa [#allocation24], 1 }

</bundles_post_ra>
